<compile_context>
chip_gen: v7x
topology: tpu7x:2x2x1
jax: 0.10.0
libtpu: 0.0.40
codegen_flags: <defaults>
</compile_context>

<pallas_src>
import functools

import jax
import jax.numpy as jnp
from jax import lax
from jax.experimental import pallas as pl
from jax.experimental.pallas import tpu as pltpu


def _round_up(x, m):
    return ((x + m - 1) // m) * m


def _conv_matmul_kernel(w_ref, p_ref, b_ref, o_ref):
    # w_ref: (OC_pad, tk)     bf16  weight tile
    # p_ref: (1, tk, tm)      bf16  patch tile of image b (K sublanes, M lanes)
    # b_ref: (OC_pad, 1)      f32   bias
    # o_ref: (1, OC_pad, tm)  f32   output tile; its block index is invariant
    #                               over the K axis, so it stays resident in
    #                               VMEM and doubles as the accumulator.
    k = pl.program_id(2)

    @pl.when(k == 0)
    def _init():
        # Fold the bias into the accumulator init (no finalize pass needed).
        o_ref[0] = jnp.broadcast_to(b_ref[...], o_ref.shape[1:])

    o_ref[0] += jnp.dot(w_ref[...], p_ref[0],
                        preferred_element_type=jnp.float32)


def _im2col(x, kernel_size, stride, padding, k_pad, m_pad):
    """x: (B, IC, H, W) f32 -> patches: (B, K_pad, M_pad) bf16.

    K = IC*KH*KW ordered (ic, kh, kw) to match weight.reshape(OC, -1);
    M = OH*OW per image.  Zero padding up to (K_pad, M_pad) in a single pad.
    """
    B, IC, H, W = x.shape
    ks, st, pad = kernel_size, stride, padding
    x = x.astype(jnp.bfloat16)          # cast first: halves glue HBM traffic
    if pad > 0:
        x = jnp.pad(x, ((0, 0), (0, 0), (pad, pad), (pad, pad)))
    OH = (H + 2 * pad - ks) // st + 1
    OW = (W + 2 * pad - ks) // st + 1
    cols = []
    for kh in range(ks):
        for kw in range(ks):
            cols.append(x[:, :, kh:kh + st * OH:st, kw:kw + st * OW:st])
    patches = jnp.stack(cols, axis=2)               # (B, IC, KH*KW, OH, OW)
    K = IC * ks * ks
    M = OH * OW
    patches = patches.reshape(B, K, M)              # K ordered (ic, kh, kw)
    patches = jnp.pad(patches, ((0, 0), (0, k_pad - K), (0, m_pad - M)))
    return patches


@functools.partial(jax.jit, static_argnames=("stride", "padding"))
def default_conv2d(x, weight, bias, *, stride=1, padding=0):
    """Forward pass of DefaultConv2d.

    x:      (B, IC, H, W)    float32, NCHW (PyTorch convention)
    weight: (OC, IC, KH, KW) float32
    bias:   (OC,)            float32
    returns (B, OC, OH, OW)  float32
    """
    B, IC, H, W = x.shape
    OC, _, KH, KW = weight.shape
    assert KH == KW, "square kernels only (matches module)"
    ks = KH

    OH = (H + 2 * padding - ks) // stride + 1
    OW = (W + 2 * padding - ks) // stride + 1
    M_im = OH * OW                      # per-image output pixels (lane axis)
    K = IC * ks * ks                    # contraction length

    OC_pad = _round_up(OC, 16)          # bf16 sublane packing of weight rows

    # --- K (contraction) tiling: resident weights for small K, a K grid axis
    # for large K so double-buffered VMEM stays bounded on every generation.
    if K <= 2048:
        K_pad = _round_up(K, 16)
        tk = K_pad
    else:
        tk = 512
        K_pad = _round_up(K, tk)

    # --- M tile from the VMEM budget.  Double-buffered footprint per step:
    #   2 * (patches tk*tm*2 + output OC_pad*tm*4 + weights OC_pad*tk*2 + bias)
    # Target <= ~20 MiB with vmem_limit_bytes = 32 MiB (safe on v5e/v6e's
    # 128 MiB and v7x's 64 MiB physical; raises v5e's 16 MiB scoped default).
    budget = 20 * 1024 * 1024
    tm_budget = (budget // 2 - OC_pad * tk * 2 - OC_pad * 4) // (tk * 2 + OC_pad * 4)
    tm_budget = max(128, min(4096, (tm_budget // 128) * 128))
    tm = min(tm_budget, _round_up(M_im, 128))
    # Keep >= 4 total (B, M) "parallel" steps when possible so v7x's two
    # TensorCores each see >= 2 steps (megacore balance + pipelining).
    while tm > 128 and B * (_round_up(M_im, tm) // tm) < 4:
        tm = max(128, _round_up(tm // 2, 128))
    M_pad = _round_up(M_im, tm)

    # --- operand preparation (bf16 inputs, f32 accumulation) ----------------
    patches = _im2col(x, ks, stride, padding, K_pad, M_pad)     # (B, K_pad, M_pad) bf16
    w_mat = weight.reshape(OC, K).astype(jnp.bfloat16)
    w_mat = jnp.pad(w_mat, ((0, OC_pad - OC), (0, K_pad - K)))  # (OC_pad, K_pad) bf16
    b_mat = jnp.pad(bias.astype(jnp.float32), (0, OC_pad - OC)).reshape(OC_pad, 1)

    grid = (B, M_pad // tm, K_pad // tk)

    cost = pl.CostEstimate(
        flops=2 * B * M_im * K * OC,
        transcendentals=0,
        bytes_accessed=(patches.size * 2 + w_mat.size * 2 + b_mat.size * 4
                        + B * OC_pad * M_pad * 4),
    )

    out = pl.pallas_call(
        _conv_matmul_kernel,
        out_shape=jax.ShapeDtypeStruct((B, OC_pad, M_pad), jnp.float32),
        grid_spec=pltpu.PrefetchScalarGridSpec(
            num_scalar_prefetch=0,
            grid=grid,
            in_specs=[
                pl.BlockSpec((OC_pad, tk), lambda b, i, k: (0, k)),    # weights
                pl.BlockSpec((1, tk, tm), lambda b, i, k: (b, k, i)),  # patches
                pl.BlockSpec((OC_pad, 1), lambda b, i, k: (0, 0)),     # bias
            ],
            out_specs=pl.BlockSpec((1, OC_pad, tm), lambda b, i, k: (b, 0, i)),
        ),
        compiler_params=pltpu.CompilerParams(
            dimension_semantics=("parallel", "parallel", "arbitrary"),
            vmem_limit_bytes=32 * 1024 * 1024),
        cost_estimate=cost,
    )(w_mat, patches, b_mat)

    # Drop OC / M zero padding (tiny copy, or a no-op when unpadded) and
    # reshape to NCHW; no transpose needed anymore.
    out = out[:, :OC, :M_im].reshape(B, OC, OH, OW)
    return out


if __name__ == "__main__":
    # Small shapes consistent with the module: B=2, IC=4, H=W=16,
    # OC=8, kernel_size=3, stride=1, padding=1.
    key = jax.random.PRNGKey(0)
    kx, kw, kb = jax.random.split(key, 3)

    B, IC, H, W = 2, 4, 16, 16
    OC, ks, stride, padding = 8, 3, 1, 1

    x = jax.random.normal(kx, (B, IC, H, W), dtype=jnp.float32)
    weight = jax.random.normal(kw, (OC, IC, ks, ks), dtype=jnp.float32)  # randn init
    bias = jax.random.normal(kb, (OC,), dtype=jnp.float32)               # randn init

    out = default_conv2d(x, weight, bias, stride=stride, padding=padding)
    out = jax.block_until_ready(out)

    # Reference with the same numerics (bf16 inputs, f32 accumulation);
    # semantics identical to the PyTorch module's unfold+mul+sum conv.
    ref = lax.conv_general_dilated(
        x.astype(jnp.bfloat16), weight.astype(jnp.bfloat16),
        window_strides=(stride, stride),
        padding=((padding, padding), (padding, padding)),
        dimension_numbers=("NCHW", "OIHW", "NCHW"),
        preferred_element_type=jnp.float32,
    ) + bias.reshape(1, -1, 1, 1)

    assert out.shape == (B, OC, H, W)
    assert jnp.allclose(out, ref, atol=1e-2, rtol=1e-2), \
        float(jnp.max(jnp.abs(out - ref)))
    print("KERNEL_OK")
</pallas_src>

<mosaic_0001>
module attributes {stable_mosaic.version = 11 : i64} {
  func.func @_conv_matmul_kernel(%arg0: i32, %arg1: i32, %arg2: i32, %arg3: memref<16x48xbf16, #tpu.memory_space<vmem>>, %arg4: memref<1x48x128xbf16, #tpu.memory_space<vmem>>, %arg5: memref<16x1xf32, #tpu.memory_space<vmem>>, %arg6: memref<1x16x128xf32, #tpu.memory_space<vmem>>) attributes {dimension_semantics = [#tpu.dimension_semantics<parallel>, #tpu.dimension_semantics<parallel>, #tpu.dimension_semantics<arbitrary>], iteration_bounds = array<i64: 2, 2, 1>, scalar_prefetch = 0 : i64, scratch_operands = 0 : i64, tpu.core_type = #tpu.core_type<tc>, window_params = [{transform_indices = @transform_0, window_bounds = array<i64: 16, 48>}, {transform_indices = @transform_1, window_bounds = array<i64: 1, 48, 128>}, {pipeline_mode = #tpu.pipeline_mode<synchronous>, transform_indices = @transform_2, window_bounds = array<i64: 16, 1>}, {transform_indices = @transform_3, window_bounds = array<i64: 1, 16, 128>}]} {
    %c0_i32 = arith.constant 0 : i32
    %0 = arith.cmpi eq, %arg2, %c0_i32 : i32
    %1 = arith.extui %0 : i1 to i32
    %c0_i32_0 = arith.constant 0 : i32
    %2 = arith.cmpi ne, %1, %c0_i32_0 : i32
    scf.if %2 {
      %c0_11 = arith.constant 0 : index
      %c0_12 = arith.constant 0 : index
      %13 = vector.load %arg5[%c0_11, %c0_12] : memref<16x1xf32, #tpu.memory_space<vmem>>, vector<16x1xf32>
      %14 = vector.shape_cast %13 : vector<16x1xf32> to vector<16x1xf32>
      %15 = vector.broadcast %14 : vector<16x1xf32> to vector<16x128xf32>
      %c0_13 = arith.constant 0 : index
      %c0_14 = arith.constant 0 : index
      %c0_15 = arith.constant 0 : index
      %16 = vector.load %arg6[%c0_13, %c0_14, %c0_15] : memref<1x16x128xf32, #tpu.memory_space<vmem>>, vector<1x16x128xf32>
      %17 = vector.shape_cast %16 : vector<1x16x128xf32> to vector<16x128xf32>
      %18 = vector.shape_cast %15 : vector<16x128xf32> to vector<1x16x128xf32>
      tpu.vector_store %arg6[%c0_13, %c0_14, %c0_15], %18 {strides = array<i32>} : memref<1x16x128xf32, #tpu.memory_space<vmem>>, vector<1x16x128xf32>,
    } else {
    }
    %c0 = arith.constant 0 : index
    %c0_1 = arith.constant 0 : index
    %c0_2 = arith.constant 0 : index
    %3 = vector.load %arg6[%c0, %c0_1, %c0_2] : memref<1x16x128xf32, #tpu.memory_space<vmem>>, vector<1x16x128xf32>
    %4 = vector.shape_cast %3 : vector<1x16x128xf32> to vector<16x128xf32>
    %c0_3 = arith.constant 0 : index
    %c0_4 = arith.constant 0 : index
    %5 = vector.load %arg3[%c0_3, %c0_4] : memref<16x48xbf16, #tpu.memory_space<vmem>>, vector<16x48xbf16>
    %c0_5 = arith.constant 0 : index
    %c0_6 = arith.constant 0 : index
    %c0_7 = arith.constant 0 : index
    %6 = vector.load %arg4[%c0_5, %c0_6, %c0_7] : memref<1x48x128xbf16, #tpu.memory_space<vmem>>, vector<1x48x128xbf16>
    %7 = vector.shape_cast %6 : vector<1x48x128xbf16> to vector<48x128xbf16>
    %cst = arith.constant dense<0.000000e+00> : vector<16x128xf32>
    %8 = tpu.matmul %5, %7, %cst {dimension_numbers = #tpu.dot_dimension_numbers<[1], [0], [0], [1], [0, 0, 1, 1], [], []>} : vector<16x48xbf16>, vector<48x128xbf16>, vector<16x128xf32> -> vector<16x128xf32>
    %9 = arith.addf %4, %8 : vector<16x128xf32>
    %c0_8 = arith.constant 0 : index
    %c0_9 = arith.constant 0 : index
    %c0_10 = arith.constant 0 : index
    %10 = vector.load %arg6[%c0_8, %c0_9, %c0_10] : memref<1x16x128xf32, #tpu.memory_space<vmem>>, vector<1x16x128xf32>
    %11 = vector.shape_cast %10 : vector<1x16x128xf32> to vector<16x128xf32>
    %12 = vector.shape_cast %9 : vector<16x128xf32> to vector<1x16x128xf32>
    tpu.vector_store %arg6[%c0_8, %c0_9, %c0_10], %12 {strides = array<i32>} : memref<1x16x128xf32, #tpu.memory_space<vmem>>, vector<1x16x128xf32>,
    return
  }
  func.func @transform_0(%arg0: i32, %arg1: i32, %arg2: i32) -> (i32, i32) {
    %c0_i32 = arith.constant 0 : i32
    %c0_i32_0 = arith.constant 0 : i32
    return %c0_i32, %arg2 : i32, i32
  }
  func.func @transform_1(%arg0: i32, %arg1: i32, %arg2: i32) -> (i32, i32, i32) {
    %c0_i32 = arith.constant 0 : i32
    return %arg0, %arg2, %arg1 : i32, i32, i32
  }
  func.func @transform_2(%arg0: i32, %arg1: i32, %arg2: i32) -> (i32, i32) {
    %c0_i32 = arith.constant 0 : i32
    %c0_i32_0 = arith.constant 0 : i32
    %c0_i32_1 = arith.constant 0 : i32
    return %c0_i32, %c0_i32_0 : i32, i32
  }
  func.func @transform_3(%arg0: i32, %arg1: i32, %arg2: i32) -> (i32, i32, i32) {
    %c0_i32 = arith.constant 0 : i32
    %c0_i32_0 = arith.constant 0 : i32
    return %arg0, %c0_i32, %arg1 : i32, i32, i32
  }
}

</mosaic_0001>

<bundles_post_ra>
// kernel: default_conv2d.1
= control target key start
LH: loop header
LB: loop body
LE: loop exit
PB: predicated region body
PF: predicated region fallthrough
CT: control target
= control target key end

     0   :  { %s692_s12 = smov 0   ;;  %s694_s13 = smov 0   ;;  %s797_s0 = inlined_call_operand.vmem [shape: bf16[16,48], index: 0, kind: input, shape index: {}]   ;;  %s798_s1 = inlined_call_operand.vmem [shape: bf16[2,48,256], index: 1, kind: input, shape index: {}]   ;;  %s799_s2 = inlined_call_operand.vmem [shape: f32[16,1], index: 2, kind: input, shape index: {}]   ;;  %s800_s3 = inlined_call_operand.vmem [shape: f32[2,16,256], index: 3, kind: output, shape index: {}]  }
   0x1   :  { %s696_s14 = smov 0   ;;  %s698_s15 = smov 0  }
   0x2   :  { %s700_s16 = smov 0   ;;  %s702_s17 = smov 0  }
   0x3   :  { %s704_s18 = smov 0  }
   0x4 LB: > { %s28_s19 = sadd.s32 1, %s659_s16  ;;  %s32_s20 = sadd.s32 1, %s663_s17  ;;  %s667_s18 = sphi %s704_s18, %s13_s18   ;;  %s663_s17 = sphi %s702_s17, %s807_s17   ;;  %s659_s16 = sphi %s700_s16, %s806_s16   ;;  %s655_s15 = sphi %s698_s15, %s805_s15   ;;  %s651_s14 = sphi %s696_s14, %s804_s14   ;;  %s647_s13 = sphi %s694_s13, %s803_s13   ;;  %s643_s12 = sphi %s692_s12, %s802_s12  }
   0x5   : > { %p30_p0 = scmp.ge.s32.totalorder %s28_s19, 2  ;;  %s514_s21 = sadd.s32 4294967295, %s667_s18  }
   0x6   : > { %p76_p1 = scmp.ne.s32.totalorder %s647_s13, %s643_s12  ;;  %p77_p2 = scmp.eq.s32.totalorder %s667_s18, 0 }
   0x7   : > { %s809_s19 = smov (%p30_p0, %s28_s19), 0  ;;  %s811_s20 = smov (!%p30_p0, %s32_s20), %s663_s17 }
   0x8   : > { %p34_p3 = scmp.ge.s32.totalorder %s811_s20, 2  ;;  %p129_p4 = scmp.eq.s32.totalorder %s514_s21, 3 }
   0x9   : > { %s65_s22 = ssub.s32 %s659_s16, %s809_s19  ;;  %p78_p5 = por %p77_p2, %p76_p1 }
   0xa   : > { %s813_s20 = smov (%p34_p3, %s811_s20), 0  ;;  %p740_p6 = por %p129_p4, %p76_p1 }
   0xb   : > { %s62_s24 = ssub.s32 %s663_s17, %s813_s20  ;;  %s69_s26 = sadd.s32 1, %s647_s13 }
   0xc   : > { %s66_s25 = sor.u32 %s65_s22, %s62_s24  ;;  %p518_p8 = scmp.ge.s32.totalorder %s667_s18, 4 }
   0xd   : > { %p67_p7 = scmp.eq.s32.totalorder %s66_s25, 0 }
   0xe   : > { %161 = sbr.rel (%p518_p8) target bundleno = 32 (0x20), region = 24 }
   0xf   : > { %s748_s27 = scalar_select %p67_p7, %s647_s13, %s69_s26  }
  0x15   : > { %164 = sbr.rel (!%p78_p5) target bundleno = 32 (0x20), region = 28  ;;  %s166_s28 = sand.u32 (%p78_p5), 1, %s647_s13  }
  0x16   : > { %s547_s29 = smul.u32 (%p78_p5), 12, %s663_s17 }
  0x17   : > { %s546_s30 = smul.u32 (%p78_p5), 24, %s166_s28 }
  0x18   : > { %s173_s4 = sadd.s32 (%p78_p5), %s659_s16, %s547_s29 }
  0x19   : > { %s519_s5 = sshll.u32 (%p78_p5), %s173_s4, 2  ;;  %s168_s9 = scalar_lea.vmem (%p78_p5), [#allocation2], %s546_s30 }
  0x1a   : > { %s175_s8 = scalar_lea.vmem (%p78_p5), %s798_s1, %s519_s5 }
  0x1b   : > { %v191_v0 = vld [vmem:[%s175_s8] sm:$0xf] (%p78_p5)  ;;  %v193_v1 = vld [vmem:[%s175_s8 + $0x8] sm:$0xf] (%p78_p5)  ;;  %v195_v2 = vld [vmem:[%s175_s8 + $0x10] sm:$0xf] (%p78_p5) }
  0x1c   : > { %192 = vst [vmem:[%s168_s9] sm:$0xf] %v191_v0  ;;  %194 = vst [vmem:[%s168_s9 + $0x4] sm:$0xf] %v193_v1  ;;  %v197_v3 = vld [vmem:[%s175_s8 + $0x18] sm:$0xf] }
  0x1d   : > { %196 = vst [vmem:[%s168_s9 + $0x8] sm:$0xf] %v195_v2  ;;  %v199_v4 = vld [vmem:[%s175_s8 + $0x20] sm:$0xf]  ;;  %v201_v5 = vld [vmem:[%s175_s8 + $0x28] sm:$0xf] }
  0x1e   : > { %198 = vst [vmem:[%s168_s9 + $0xc] sm:$0xf] %v197_v3  ;;  %200 = vst [vmem:[%s168_s9 + $0x10] sm:$0xf] %v199_v4 }
  0x1f   : > { %202 = vst [vmem:[%s168_s9 + $0x14] sm:$0xf] %v201_v5 }
  0x20 PF: > { %p520_p9 = scmp.ge.s32.totalorder %s667_s18, 1  ;;  %p236_p10 = scmp.lt.s32.totalorder %s667_s18, 5 }
  0x22   : > { %p237_p11 = pnand %p520_p9, %p236_p10 }
  0x23   : > { %s243_s10 = sand.u32 (!%p237_p11), 1, %s643_s12   ;;  %v669_v6 = vmov (!%p237_p11), 0.0   ;;  %vm670_vm0 = vmmov (!%p237_p11), 0   ;;  %v279_v7 = vld [vmem:[%s799_s2] sm:$0xff] (!%p237_p11)  ;;  %v671_v8 = vmov (!%p237_p11), 0   ;;  %v280_v9 = vld [vmem:[%s799_s2 + $0x8] sm:$0xff] (!%p237_p11) }
  0x24   : > { %240 = sbr.rel (%p237_p11) target bundleno = 277 (0x115), region = 69  ;;  %536 = vmatprep.subr.bf16.mxu0 (!%p237_p11), %v669_v6  ;;  %542 = vmatprep.mubr.msk.bf16.mxu0 (!%p237_p11), %vm670_vm0, %v669_v6  ;;  %v612_v13 = vld [vmem:[%s797_s0] sm:$0xff] (!%p237_p11)   ;;  %vm326_vm1 = vcmask (!%p237_p11), 392192   ;;  %s521_s29 = sshll.u32 (!%p237_p11), %s243_s10, 4 }
  0x25   : > { %s548_s11 = smul.u32 (!%p237_p11), 24, %s243_s10  ;;  %608 = vset.pattern.permute.xlu0 (!%p237_p11), %v671_v8  ;;  %s268_s30 = scalar_lea.vmem (!%p237_p11), [#allocation3], %s521_s29 }
  0x26   : > { %283 = vperm.xlu0 (!%p237_p11), %608, %v279_v7  }
  0x27   : > { %s245_s26 = scalar_lea.vmem (!%p237_p11), [#allocation2], %s548_s11 }
  0x28   : > { %v609_v10 = vld [vmem:[%s245_s26] sm:$0xff] (!%p237_p11)   ;;  %v610_v11 = vld [vmem:[%s245_s26 + $0x8] sm:$0xff] (!%p237_p11)   ;;  %v611_v12 = vld [vmem:[%s245_s26 + $0x10] sm:$0xff] (!%p237_p11)  }
  0x29   : > { %537 = vmatpush3.bf16.msra.mxu0 (!%p237_p11), %v609_v10 }
  0x2a   : > { %538 = vmatprep.subr.bf16.mxu0 (!%p237_p11), %v669_v6  ;;  %288 = vperm.xlu0 (!%p237_p11), %608, %v280_v9  }
  0x2b   : > { %s528_s4 = sshll.u32 (%p740_p6), %s655_s15, 2 }
  0x2c   : > { %s383_s5 = sadd.s32 (%p740_p6), %s651_s14, %s528_s4 }
  0x2d   : > { %539 = vmatpush3.bf16.msra.mxu0 %v610_v11  ;;  %s529_s6 = sshll.u32 (%p740_p6), %s383_s5, 3 }
  0x2e   : > { %540 = vmatprep.subr.bf16.mxu0 %v669_v6  ;;  %s385_s9 = scalar_lea.vmem (%p740_p6), %s800_s3, %s529_s6 }
  0x31   : > { %541 = vmatpush3.bf16.msra.mxu0 %v611_v12 }
  0x34   : > { %543 = vmatmul.mubr.msk.bf16.vlgmr.msra.gmra.mrb[0].mxu0 %vm326_vm1, %v612_v13 }
  0xa5   : > { %v284_v14 = vpop.permute.xlu0 %283 }
  0xa9   : > { %v289_v18 = vpop.permute.xlu0 %288 }
 0x106   : > { %381 = sbr.rel (!%p740_p6) target bundleno = 277 (0x115), region = 81 }
 0x107   : > { %v364_v15 = vpop.f32.mrb[0].mxu0 }
 0x108   : > { %v371_v16 = vadd.f32 %v364_v15, %v284_v14  ;;  %v544_v17 = vpop.f32.mrb[1].mxu0 }
 0x109   : > { %v367_v19 = vpop.f32.mrb[2].mxu0 }
 0x10a   : > { %373 = vst [vmem:[%s268_s30] sm:$0xff] %v371_v16  ;;  %v372_v20 = vadd.f32 %v367_v19, %v289_v18  ;;  %v545_v21 = vpop.f32.mrb[3].mxu0 }
 0x10c   : > { %374 = vst [vmem:[%s268_s30 + $0x8] sm:$0xff] %v372_v20 }
 0x111   : > { %v415_v22 = vld [vmem:[%s268_s30] sm:$0xff] }
 0x112   : > { %416 = vst [vmem:[%s385_s9] sm:$0xff] %v415_v22 }
 0x113   : > { %v417_v23 = vld [vmem:[%s268_s30 + $0x8] sm:$0xff] }
 0x114   : > { %418 = vst [vmem:[%s385_s9 + $0x10] sm:$0xff] %v417_v23 }
 0x115 PF: > { %s13_s18 = sadd.s32 1, %s667_s18   ;;  %s802_s12 = smov %s647_s13 }
 0x116   : > { %p10_p12 = scmp.ge.s32.totalorder %s13_s18, 6   ;;  %s803_s13 = smov %s748_s27 }
 0x117   : > { %s804_s14 = smov %s659_s16  ;;  %s805_s15 = smov %s663_s17 }
 0x118   : > { %s806_s16 = smov %s809_s19  ;;  %s807_s17 = smov %s813_s20 }
 0x119   :  { %12 = sbr.rel (!%p10_p12) target bundleno = 4 (0x4), region = 153 }

</bundles_post_ra>
